<compile_context>
chip_gen: v6e
topology: v6e:2x2x1
jax: 0.10.0
libtpu: 0.0.40
codegen_flags: <defaults>
</compile_context>

<pallas_src>
import functools

import jax
import jax.numpy as jnp
from jax.experimental import pallas as pl
from jax.experimental.pallas import tpu as pltpu


IN_DIM = 768
PROJ_DIM = 128
DEFAULT_BATCH_TILE = 1024          # rows per grid step (multiple of 8)
VMEM_LIMIT_BYTES = 48 * 1024 * 1024  # < 64 MiB physical on v7x; ample headroom


# ----------------------------------------------------------------------------
# Kernel bodies
# ----------------------------------------------------------------------------
def _project(x_ref, w1_ref, b1_ref, w2_ref, b2_ref, o_ref, mxu_dtype):
    """ReLU(x @ W1 + b1) @ W2 + b2 for one batch tile (f32 accumulation).

    mxu_dtype=None  -> feed the MXU with the stored dtype (exact vs. module).
    mxu_dtype=bf16  -> cast x / W in-register just before the matmuls; zero
                       extra HBM traffic, full bf16 MXU rate (v5e win).
    """
    x = x_ref[...]
    w1 = w1_ref[...]
    w2 = w2_ref[...]
    if mxu_dtype is not None:
        x = x.astype(mxu_dtype)
        w1 = w1.astype(mxu_dtype)
        w2 = w2.astype(mxu_dtype)
    h = jnp.dot(x, w1, preferred_element_type=jnp.float32)
    h = jnp.maximum(h + b1_ref[...], 0.0)            # bias + ReLU in f32
    z = jnp.dot(h.astype(w2.dtype), w2, preferred_element_type=jnp.float32)
    o_ref[...] = (z + b2_ref[...]).astype(o_ref.dtype)


def _fused_kernel(xd_ref, xn_ref,
                  dw1_ref, db1_ref, dw2_ref, db2_ref,
                  nw1_ref, nb1_ref, nw2_ref, nb2_ref,
                  od_ref, on_ref, *, mxu_dtype):
    """Both projection heads for one batch tile (single pipeline/launch)."""
    _project(xd_ref, dw1_ref, db1_ref, dw2_ref, db2_ref, od_ref, mxu_dtype)
    _project(xn_ref, nw1_ref, nb1_ref, nw2_ref, nb2_ref, on_ref, mxu_dtype)


def _single_kernel(x_ref, w1_ref, b1_ref, w2_ref, b2_ref, o_ref, *, mxu_dtype):
    """One projection head for one batch tile (used when Bd != Bn)."""
    _project(x_ref, w1_ref, b1_ref, w2_ref, b2_ref, o_ref, mxu_dtype)


# ----------------------------------------------------------------------------
# Wrappers
# ----------------------------------------------------------------------------
def _pick_tile(batch, desired):
    # Whole batch in one step when it fits (block == full array dim is always
    # layout-legal, even for odd row counts); otherwise a sublane-aligned tile
    # with grid = cdiv(B, tile) and a masked partial edge block.  No padding.
    return batch if batch <= desired else desired


def _compiler_params():
    return pltpu.CompilerParams(
        dimension_semantics=("parallel",),
        vmem_limit_bytes=VMEM_LIMIT_BYTES,
    )


def _fused_forward(params, phi_d, phi_n, batch_tile, mxu_dtype):
    d_w1, d_b1, d_w2, d_b2 = params["proj_d"]
    n_w1, n_b1, n_w2, n_b2 = params["proj_n"]

    batch, in_dim = phi_d.shape
    proj = d_w1.shape[1]
    tile = _pick_tile(batch, batch_tile)
    grid = (pl.cdiv(batch, tile),)

    x_spec = pl.BlockSpec((tile, in_dim), lambda i: (i, 0))
    w1_spec = pl.BlockSpec((in_dim, proj), lambda i: (0, 0))
    w2_spec = pl.BlockSpec((proj, proj), lambda i: (0, 0))
    b_spec = pl.BlockSpec((1, proj), lambda i: (0, 0))
    o_spec = pl.BlockSpec((tile, proj), lambda i: (i, 0))

    kernel = functools.partial(_fused_kernel, mxu_dtype=mxu_dtype)
    return pl.pallas_call(
        kernel,
        out_shape=(
            jax.ShapeDtypeStruct((batch, proj), jnp.float32),
            jax.ShapeDtypeStruct((batch, proj), jnp.float32),
        ),
        grid_spec=pltpu.PrefetchScalarGridSpec(
            num_scalar_prefetch=0,
            grid=grid,
            in_specs=[
                x_spec, x_spec,                       # phi_d tile, phi_n tile
                w1_spec, b_spec, w2_spec, b_spec,     # proj_d params
                w1_spec, b_spec, w2_spec, b_spec,     # proj_n params
            ],
            out_specs=[o_spec, o_spec],
        ),
        compiler_params=_compiler_params(),
    )(phi_d, phi_n, d_w1, d_b1, d_w2, d_b2, n_w1, n_b1, n_w2, n_b2)


def _single_forward(head_params, x, batch_tile, mxu_dtype):
    w1, b1, w2, b2 = head_params
    batch, in_dim = x.shape
    proj = w1.shape[1]
    tile = _pick_tile(batch, batch_tile)
    grid = (pl.cdiv(batch, tile),)

    kernel = functools.partial(_single_kernel, mxu_dtype=mxu_dtype)
    return pl.pallas_call(
        kernel,
        out_shape=jax.ShapeDtypeStruct((batch, proj), jnp.float32),
        grid_spec=pltpu.PrefetchScalarGridSpec(
            num_scalar_prefetch=0,
            grid=grid,
            in_specs=[
                pl.BlockSpec((tile, in_dim), lambda i: (i, 0)),
                pl.BlockSpec((in_dim, proj), lambda i: (0, 0)),
                pl.BlockSpec((1, proj), lambda i: (0, 0)),
                pl.BlockSpec((proj, proj), lambda i: (0, 0)),
                pl.BlockSpec((1, proj), lambda i: (0, 0)),
            ],
            out_specs=pl.BlockSpec((tile, proj), lambda i: (i, 0)),
        ),
        compiler_params=_compiler_params(),
    )(x, w1, b1, w2, b2)


def diet_food_contrastive_forward(
    params, phi_d, phi_n, *,
    batch_tile=DEFAULT_BATCH_TILE,
    mxu_dtype=None,
):
    """Forward pass of both projection heads.

    params: dict with "proj_d"/"proj_n" -> (W1 (in,proj), b1 (1,proj),
                                            W2 (proj,proj), b2 (1,proj))
    phi_d: (Bd, in_dim), phi_n: (Bn, in_dim).  Inputs are consumed in their
    stored dtype straight from HBM (no wrapper-side cast/pad passes).
    mxu_dtype: None (exact) or jnp.bfloat16 (in-kernel MXU cast, f32 acc).
    returns: z_d (Bd, proj_dim) f32, z_n (Bn, proj_dim) f32
    """
    batch_tile = max(8, (int(batch_tile) // 8) * 8)

    if phi_d.shape[0] == phi_n.shape[0]:
        # Common contrastive case: one fused call, weights resident in VMEM.
        return _fused_forward(params, phi_d, phi_n, batch_tile, mxu_dtype)

    # Unequal batches: two calls so the smaller head never DMAs/computes
    # padding (previously up to (max-min)/max of one head's work was wasted).
    z_d = _single_forward(params["proj_d"], phi_d, batch_tile, mxu_dtype)
    z_n = _single_forward(params["proj_n"], phi_n, batch_tile, mxu_dtype)
    return z_d, z_n


# ----------------------------------------------------------------------------
# Params / reference
# ----------------------------------------------------------------------------
def init_linear_params(key, in_features, out_features):
    """PyTorch-style uniform init; weight stored as (in, out)."""
    k_w, k_b = jax.random.split(key)
    bound = 1.0 / jnp.sqrt(in_features)
    w = jax.random.uniform(
        k_w, (in_features, out_features), jnp.float32, -bound, bound
    )
    b = jax.random.uniform(k_b, (1, out_features), jnp.float32, -bound, bound)
    return w, b


def init_model_params(key, in_dim=IN_DIM, proj_dim=PROJ_DIM):
    keys = jax.random.split(key, 4)
    d_w1, d_b1 = init_linear_params(keys[0], in_dim, proj_dim)
    d_w2, d_b2 = init_linear_params(keys[1], proj_dim, proj_dim)
    n_w1, n_b1 = init_linear_params(keys[2], in_dim, proj_dim)
    n_w2, n_b2 = init_linear_params(keys[3], proj_dim, proj_dim)
    return {
        "proj_d": (d_w1, d_b1, d_w2, d_b2),
        "proj_n": (n_w1, n_b1, n_w2, n_b2),
    }


def _reference_forward(params, phi_d, phi_n):
    """Pure-JAX f32 reference for correctness checking."""
    def mlp(x, w1, b1, w2, b2):
        h = jnp.maximum(x @ w1 + b1, 0.0)
        return h @ w2 + b2
    return mlp(phi_d, *params["proj_d"]), mlp(phi_n, *params["proj_n"])


# ----------------------------------------------------------------------------
# Self-test
# ----------------------------------------------------------------------------
if __name__ == "__main__":
    key = jax.random.PRNGKey(0)
    k_params, k_d, k_n, k_d2, k_n2, k_d3, k_n3 = jax.random.split(key, 7)

    params = init_model_params(k_params)

    # --- Case 1: small equal batches, exact f32 fused path ----------------
    batch = 8
    phi_d = jax.random.normal(k_d, (batch, IN_DIM), jnp.float32)
    phi_n = jax.random.normal(k_n, (batch, IN_DIM), jnp.float32)

    z_d, z_n = diet_food_contrastive_forward(params, phi_d, phi_n)
    jax.block_until_ready((z_d, z_n))

    ref_d, ref_n = _reference_forward(params, phi_d, phi_n)
    assert z_d.shape == (batch, PROJ_DIM) and z_n.shape == (batch, PROJ_DIM)
    assert jnp.allclose(z_d, ref_d, atol=1e-4, rtol=1e-4)
    assert jnp.allclose(z_n, ref_n, atol=1e-4, rtol=1e-4)

    # --- Case 2: unequal batches (two single-head calls, no padded work) --
    phi_d2 = jax.random.normal(k_d2, (13, IN_DIM), jnp.float32)
    phi_n2 = jax.random.normal(k_n2, (20, IN_DIM), jnp.float32)
    z_d2, z_n2 = diet_food_contrastive_forward(params, phi_d2, phi_n2)
    jax.block_until_ready((z_d2, z_n2))
    ref_d2, ref_n2 = _reference_forward(params, phi_d2, phi_n2)
    assert z_d2.shape == (13, PROJ_DIM) and z_n2.shape == (20, PROJ_DIM)
    assert jnp.allclose(z_d2, ref_d2, atol=1e-4, rtol=1e-4)
    assert jnp.allclose(z_n2, ref_n2, atol=1e-4, rtol=1e-4)

    # --- Case 3: multi-step grid with a partial edge block (no padding) ---
    phi_d3 = jax.random.normal(k_d3, (40, IN_DIM), jnp.float32)
    phi_n3 = jax.random.normal(k_n3, (40, IN_DIM), jnp.float32)
    z_d3, z_n3 = diet_food_contrastive_forward(
        params, phi_d3, phi_n3, batch_tile=16
    )
    jax.block_until_ready((z_d3, z_n3))
    ref_d3, ref_n3 = _reference_forward(params, phi_d3, phi_n3)
    assert jnp.allclose(z_d3, ref_d3, atol=1e-4, rtol=1e-4)
    assert jnp.allclose(z_n3, ref_n3, atol=1e-4, rtol=1e-4)

    # --- Case 4: in-kernel bf16 MXU feed (v5e-oriented compute path) ------
    z_d4, z_n4 = diet_food_contrastive_forward(
        params, phi_d, phi_n, mxu_dtype=jnp.bfloat16
    )
    jax.block_until_ready((z_d4, z_n4))
    assert jnp.allclose(z_d4, ref_d, atol=1e-1, rtol=1e-1)
    assert jnp.allclose(z_n4, ref_n, atol=1e-1, rtol=1e-1)

    print("KERNEL_OK")
</pallas_src>

<mosaic_0001>
module attributes {stable_mosaic.version = 11 : i64} {
  func.func @_fused_kernel(%arg0: i32, %arg1: memref<8x768xf32, #tpu.memory_space<vmem>>, %arg2: memref<8x768xf32, #tpu.memory_space<vmem>>, %arg3: memref<768x128xf32, #tpu.memory_space<vmem>>, %arg4: memref<1x128xf32, #tpu.memory_space<vmem>>, %arg5: memref<128x128xf32, #tpu.memory_space<vmem>>, %arg6: memref<1x128xf32, #tpu.memory_space<vmem>>, %arg7: memref<768x128xf32, #tpu.memory_space<vmem>>, %arg8: memref<1x128xf32, #tpu.memory_space<vmem>>, %arg9: memref<128x128xf32, #tpu.memory_space<vmem>>, %arg10: memref<1x128xf32, #tpu.memory_space<vmem>>, %arg11: memref<8x128xf32, #tpu.memory_space<vmem>>, %arg12: memref<8x128xf32, #tpu.memory_space<vmem>>) attributes {dimension_semantics = [#tpu.dimension_semantics<parallel>], iteration_bounds = array<i64: 1>, scalar_prefetch = 0 : i64, scratch_operands = 0 : i64, tpu.core_type = #tpu.core_type<tc>, window_params = [{transform_indices = @transform_0, window_bounds = array<i64: 8, 768>}, {transform_indices = @transform_1, window_bounds = array<i64: 8, 768>}, {pipeline_mode = #tpu.pipeline_mode<synchronous>, transform_indices = @transform_2, window_bounds = array<i64: 768, 128>}, {pipeline_mode = #tpu.pipeline_mode<synchronous>, transform_indices = @transform_3, window_bounds = array<i64: 1, 128>}, {pipeline_mode = #tpu.pipeline_mode<synchronous>, transform_indices = @transform_4, window_bounds = array<i64: 128, 128>}, {pipeline_mode = #tpu.pipeline_mode<synchronous>, transform_indices = @transform_5, window_bounds = array<i64: 1, 128>}, {pipeline_mode = #tpu.pipeline_mode<synchronous>, transform_indices = @transform_6, window_bounds = array<i64: 768, 128>}, {pipeline_mode = #tpu.pipeline_mode<synchronous>, transform_indices = @transform_7, window_bounds = array<i64: 1, 128>}, {pipeline_mode = #tpu.pipeline_mode<synchronous>, transform_indices = @transform_8, window_bounds = array<i64: 128, 128>}, {pipeline_mode = #tpu.pipeline_mode<synchronous>, transform_indices = @transform_9, window_bounds = array<i64: 1, 128>}, {transform_indices = @transform_10, window_bounds = array<i64: 8, 128>}, {transform_indices = @transform_11, window_bounds = array<i64: 8, 128>}]} {
    %c0 = arith.constant 0 : index
    %c0_0 = arith.constant 0 : index
    %0 = vector.load %arg1[%c0, %c0_0] : memref<8x768xf32, #tpu.memory_space<vmem>>, vector<8x768xf32>
    %c0_1 = arith.constant 0 : index
    %c0_2 = arith.constant 0 : index
    %1 = vector.load %arg3[%c0_1, %c0_2] : memref<768x128xf32, #tpu.memory_space<vmem>>, vector<768x128xf32>
    %c0_3 = arith.constant 0 : index
    %c0_4 = arith.constant 0 : index
    %2 = vector.load %arg5[%c0_3, %c0_4] : memref<128x128xf32, #tpu.memory_space<vmem>>, vector<128x128xf32>
    %cst = arith.constant dense<0.000000e+00> : vector<8x128xf32>
    %3 = tpu.matmul %0, %1, %cst {dimension_numbers = #tpu.dot_dimension_numbers<[1], [0], [0], [1], [0, 0, 1, 1], [], []>} : vector<8x768xf32>, vector<768x128xf32>, vector<8x128xf32> -> vector<8x128xf32>
    %c0_5 = arith.constant 0 : index
    %c0_6 = arith.constant 0 : index
    %4 = vector.load %arg4[%c0_5, %c0_6] : memref<1x128xf32, #tpu.memory_space<vmem>>, vector<1x128xf32>
    %5 = vector.broadcast %4 : vector<1x128xf32> to vector<8x128xf32>
    %6 = arith.addf %3, %5 : vector<8x128xf32>
    %cst_7 = arith.constant 0.000000e+00 : f32
    %7 = vector.broadcast %cst_7 : f32 to vector<8x128xf32>
    %8 = arith.maximumf %6, %7 : vector<8x128xf32>
    %cst_8 = arith.constant dense<0.000000e+00> : vector<8x128xf32>
    %9 = tpu.matmul %8, %2, %cst_8 {dimension_numbers = #tpu.dot_dimension_numbers<[1], [0], [0], [1], [0, 0, 1, 1], [], []>} : vector<8x128xf32>, vector<128x128xf32>, vector<8x128xf32> -> vector<8x128xf32>
    %c0_9 = arith.constant 0 : index
    %c0_10 = arith.constant 0 : index
    %10 = vector.load %arg6[%c0_9, %c0_10] : memref<1x128xf32, #tpu.memory_space<vmem>>, vector<1x128xf32>
    %11 = vector.broadcast %10 : vector<1x128xf32> to vector<8x128xf32>
    %12 = arith.addf %9, %11 : vector<8x128xf32>
    %c0_11 = arith.constant 0 : index
    %c0_12 = arith.constant 0 : index
    %13 = vector.load %arg11[%c0_11, %c0_12] : memref<8x128xf32, #tpu.memory_space<vmem>>, vector<8x128xf32>
    tpu.vector_store %arg11[%c0_11, %c0_12], %12 {strides = array<i32>} : memref<8x128xf32, #tpu.memory_space<vmem>>, vector<8x128xf32>,
    %c0_13 = arith.constant 0 : index
    %c0_14 = arith.constant 0 : index
    %14 = vector.load %arg2[%c0_13, %c0_14] : memref<8x768xf32, #tpu.memory_space<vmem>>, vector<8x768xf32>
    %c0_15 = arith.constant 0 : index
    %c0_16 = arith.constant 0 : index
    %15 = vector.load %arg7[%c0_15, %c0_16] : memref<768x128xf32, #tpu.memory_space<vmem>>, vector<768x128xf32>
    %c0_17 = arith.constant 0 : index
    %c0_18 = arith.constant 0 : index
    %16 = vector.load %arg9[%c0_17, %c0_18] : memref<128x128xf32, #tpu.memory_space<vmem>>, vector<128x128xf32>
    %cst_19 = arith.constant dense<0.000000e+00> : vector<8x128xf32>
    %17 = tpu.matmul %14, %15, %cst_19 {dimension_numbers = #tpu.dot_dimension_numbers<[1], [0], [0], [1], [0, 0, 1, 1], [], []>} : vector<8x768xf32>, vector<768x128xf32>, vector<8x128xf32> -> vector<8x128xf32>
    %c0_20 = arith.constant 0 : index
    %c0_21 = arith.constant 0 : index
    %18 = vector.load %arg8[%c0_20, %c0_21] : memref<1x128xf32, #tpu.memory_space<vmem>>, vector<1x128xf32>
    %19 = vector.broadcast %18 : vector<1x128xf32> to vector<8x128xf32>
    %20 = arith.addf %17, %19 : vector<8x128xf32>
    %cst_22 = arith.constant 0.000000e+00 : f32
    %21 = vector.broadcast %cst_22 : f32 to vector<8x128xf32>
    %22 = arith.maximumf %20, %21 : vector<8x128xf32>
    %cst_23 = arith.constant dense<0.000000e+00> : vector<8x128xf32>
    %23 = tpu.matmul %22, %16, %cst_23 {dimension_numbers = #tpu.dot_dimension_numbers<[1], [0], [0], [1], [0, 0, 1, 1], [], []>} : vector<8x128xf32>, vector<128x128xf32>, vector<8x128xf32> -> vector<8x128xf32>
    %c0_24 = arith.constant 0 : index
    %c0_25 = arith.constant 0 : index
    %24 = vector.load %arg10[%c0_24, %c0_25] : memref<1x128xf32, #tpu.memory_space<vmem>>, vector<1x128xf32>
    %25 = vector.broadcast %24 : vector<1x128xf32> to vector<8x128xf32>
    %26 = arith.addf %23, %25 : vector<8x128xf32>
    %c0_26 = arith.constant 0 : index
    %c0_27 = arith.constant 0 : index
    %27 = vector.load %arg12[%c0_26, %c0_27] : memref<8x128xf32, #tpu.memory_space<vmem>>, vector<8x128xf32>
    tpu.vector_store %arg12[%c0_26, %c0_27], %26 {strides = array<i32>} : memref<8x128xf32, #tpu.memory_space<vmem>>, vector<8x128xf32>,
    return
  }
  func.func @transform_0(%arg0: i32) -> (i32, i32) {
    %c0_i32 = arith.constant 0 : i32
    %c0_i32_0 = arith.constant 0 : i32
    return %arg0, %c0_i32 : i32, i32
  }
  func.func @transform_1(%arg0: i32) -> (i32, i32) {
    %c0_i32 = arith.constant 0 : i32
    %c0_i32_0 = arith.constant 0 : i32
    return %arg0, %c0_i32 : i32, i32
  }
  func.func @transform_2(%arg0: i32) -> (i32, i32) {
    %c0_i32 = arith.constant 0 : i32
    %c0_i32_0 = arith.constant 0 : i32
    %c0_i32_1 = arith.constant 0 : i32
    return %c0_i32, %c0_i32_0 : i32, i32
  }
  func.func @transform_3(%arg0: i32) -> (i32, i32) {
    %c0_i32 = arith.constant 0 : i32
    %c0_i32_0 = arith.constant 0 : i32
    %c0_i32_1 = arith.constant 0 : i32
    return %c0_i32, %c0_i32_0 : i32, i32
  }
  func.func @transform_4(%arg0: i32) -> (i32, i32) {
    %c0_i32 = arith.constant 0 : i32
    %c0_i32_0 = arith.constant 0 : i32
    %c0_i32_1 = arith.constant 0 : i32
    return %c0_i32, %c0_i32_0 : i32, i32
  }
  func.func @transform_5(%arg0: i32) -> (i32, i32) {
    %c0_i32 = arith.constant 0 : i32
    %c0_i32_0 = arith.constant 0 : i32
    %c0_i32_1 = arith.constant 0 : i32
    return %c0_i32, %c0_i32_0 : i32, i32
  }
  func.func @transform_6(%arg0: i32) -> (i32, i32) {
    %c0_i32 = arith.constant 0 : i32
    %c0_i32_0 = arith.constant 0 : i32
    %c0_i32_1 = arith.constant 0 : i32
    return %c0_i32, %c0_i32_0 : i32, i32
  }
  func.func @transform_7(%arg0: i32) -> (i32, i32) {
    %c0_i32 = arith.constant 0 : i32
    %c0_i32_0 = arith.constant 0 : i32
    %c0_i32_1 = arith.constant 0 : i32
    return %c0_i32, %c0_i32_0 : i32, i32
  }
  func.func @transform_8(%arg0: i32) -> (i32, i32) {
    %c0_i32 = arith.constant 0 : i32
    %c0_i32_0 = arith.constant 0 : i32
    %c0_i32_1 = arith.constant 0 : i32
    return %c0_i32, %c0_i32_0 : i32, i32
  }
  func.func @transform_9(%arg0: i32) -> (i32, i32) {
    %c0_i32 = arith.constant 0 : i32
    %c0_i32_0 = arith.constant 0 : i32
    %c0_i32_1 = arith.constant 0 : i32
    return %c0_i32, %c0_i32_0 : i32, i32
  }
  func.func @transform_10(%arg0: i32) -> (i32, i32) {
    %c0_i32 = arith.constant 0 : i32
    %c0_i32_0 = arith.constant 0 : i32
    return %arg0, %c0_i32 : i32, i32
  }
  func.func @transform_11(%arg0: i32) -> (i32, i32) {
    %c0_i32 = arith.constant 0 : i32
    %c0_i32_0 = arith.constant 0 : i32
    return %arg0, %c0_i32 : i32, i32
  }
}

</mosaic_0001>

<bundles_post_ra>
// kernel: tpu_custom_call.1
= control target key start
LH: loop header
LB: loop body
LE: loop exit
PB: predicated region body
PF: predicated region fallthrough
CT: control target
= control target key end

     0   :  { %17 = vsyncpa [#allocation3], 0  ;;  %s1635_s0 = inlined_call_operand.hbm [shape: f32[8,768], index: 0, kind: input, shape index: {}]   ;;  %s1636_s1 = inlined_call_operand.hbm [shape: f32[8,768], index: 1, kind: input, shape index: {}]   ;;  %s1637_s2 = inlined_call_operand.hbm [shape: f32[768,128], index: 2, kind: input, shape index: {}]   ;;  %s1638_s3 = inlined_call_operand.vmem [shape: f32[1,128], index: 3, kind: input, shape index: {}]   ;;  %s1639_s4 = inlined_call_operand.hbm [shape: f32[128,128], index: 4, kind: input, shape index: {}]   ;;  %s1640_s5 = inlined_call_operand.vmem [shape: f32[1,128], index: 5, kind: input, shape index: {}]   ;;  %s1641_s6 = inlined_call_operand.hbm [shape: f32[768,128], index: 6, kind: input, shape index: {}]   ;;  %s1642_s7 = inlined_call_operand.vmem [shape: f32[1,128], index: 7, kind: input, shape index: {}]   ;;  %s1643_s8 = inlined_call_operand.hbm [shape: f32[128,128], index: 8, kind: input, shape index: {}]   ;;  %s1644_s9 = inlined_call_operand.vmem [shape: f32[1,128], index: 9, kind: input, shape index: {}]   ;;  %s1645_s10 = inlined_call_operand.hbm [shape: f32[8,128], index: 10, kind: output, shape index: {0}]   ;;  %s1646_s11 = inlined_call_operand.hbm [shape: f32[8,128], index: 11, kind: output, shape index: {1}]  }
   0x1   :  { %18 = vsyncpa [#allocation6], 0 }
   0x2   :  { %19 = vsyncpa [#allocation9], 0 }
   0x3   :  { %20 = vsyncpa [#allocation12], 0 }
   0x4   :  { %21 = vsyncpa [#allocation4], 0 }
   0x5   :  { %22 = vsyncpa [#allocation15], 0  ;;  %s1479_s17 = smov [#allocation5]  }
   0x6   :  { %s39_s18 = sshll.u32 %s1479_s17, 4  ;;  %s40_s18 = int_to_ptr.vmem [resolvable:$true] %s39_s18 }
   0x7   :  { %s1315_s19 = scalar_lea.vmem %s40_s18, 768  ;;  %p1320_p1 = scmp.lt.s32.totalorder %s40_s18, %s40_s18 }
   0x8   :  { %p1316_p0 = scmp.ne.s32.totalorder %s40_s18, %s1315_s19  ;;  %p1321_p2 = scmp.lt.s32.totalorder %s1315_s19, %s1315_s19 }
   0xa   :  { %p1322_p3 = por %p1321_p2, %p1320_p1 }
   0xc   :  { %p1323_p4 = pnand %p1322_p3, %p1316_p0 }
   0xe   :  { %1326 = shalt.err (!%p1323_p4)
}
   0xf   :  { %42 = dma.hbm_to_vmem [thread:$0]  %s1636_s1, 768, %s40_s18, [#allocation6]  }
  0x10   :  { %s1480_s22 = smov [#allocation8]   ;;  %s1481_s24 = smov [#allocation2]  }
  0x11   :  { %s62_s23 = sshll.u32 %s1480_s22, 4  ;;  %s29_s25 = sshll.u32 %s1481_s24, 4  ;;  %s63_s23 = int_to_ptr.vmem [resolvable:$true] %s62_s23  ;;  %s30_s25 = int_to_ptr.vmem [resolvable:$true] %s29_s25 }
  0x12   :  { %s1335_s26 = scalar_lea.vmem %s63_s23, 2048  ;;  %p1340_p6 = scmp.lt.s32.totalorder %s63_s23, %s63_s23 }
  0x13   :  { %p1336_p5 = scmp.ne.s32.totalorder %s63_s23, %s1335_s26  ;;  %p1341_p7 = scmp.lt.s32.totalorder %s1335_s26, %s1335_s26 }
  0x15   :  { %p1342_p8 = por %p1341_p7, %p1340_p6 }
  0x17   :  { %p1343_p9 = pnand %p1342_p8, %p1336_p5 }
  0x19   :  { %1346 = shalt.err (!%p1343_p9)
}
  0x1a   :  { %s1482_s27 = smov 128   ;;  %s1483_s28 = smov 8  }
  0x1b   :  { %68 = dma.hbm_to_vmem [thread:$0]  %s1639_s4, 2048, %s63_s23, [#allocation9], %s1482_s27, %s1482_s27, %s1483_s28  }
  0x1c   :  { %s1355_s1 = scalar_lea.vmem %s30_s25, 768  ;;  %p1360_p11 = scmp.lt.s32.totalorder %s30_s25, %s30_s25 }
  0x1d   :  { %p1356_p10 = scmp.ne.s32.totalorder %s30_s25, %s1355_s1  ;;  %p1361_p12 = scmp.lt.s32.totalorder %s1355_s1, %s1355_s1 }
  0x1f   :  { %p1362_p13 = por %p1361_p12, %p1360_p11 }
  0x21   :  { %p1363_p0 = pnand %p1362_p13, %p1356_p10 }
  0x23   :  { %1366 = shalt.err (!%p1363_p0)
}
  0x24   :  { %32 = dma.hbm_to_vmem [thread:$0]  %s1635_s0, 768, %s30_s25, [#allocation3]  }
  0x25   :  { %s1484_s14 = smov [#allocation7]   ;;  %s1485_s16 = smov [#allocation10]  }
  0x26   :  { %s48_s15 = sshll.u32 %s1484_s14, 4  ;;  %s76_s17 = sshll.u32 %s1485_s16, 4  ;;  %s49_s15 = int_to_ptr.vmem [resolvable:$true] %s48_s15  ;;  %s77_s17 = int_to_ptr.vmem [resolvable:$true] %s76_s17 }
  0x27   :  { %s1375_s18 = scalar_lea.vmem %s49_s15, 12288  ;;  %p1380_p2 = scmp.lt.s32.totalorder %s49_s15, %s49_s15 }
  0x28   :  { %p1376_p1 = scmp.ne.s32.totalorder %s49_s15, %s1375_s18  ;;  %p1381_p3 = scmp.lt.s32.totalorder %s1375_s18, %s1375_s18 }
  0x2a   :  { %p1382_p4 = por %p1381_p3, %p1380_p2 }
  0x2c   :  { %p1383_p5 = pnand %p1382_p4, %p1376_p1 }
  0x2e   :  { %1386 = shalt.err (!%p1383_p5)
}
  0x2f   :  { %54 = dma.hbm_to_vmem [thread:$0]  %s1637_s2, 12288, %s49_s15, [#allocation6], %s1482_s27, %s1482_s27, %s1483_s28  }
  0x30   :  { %s1395_s0 = scalar_lea.vmem %s77_s17, 12288  ;;  %p1400_p7 = scmp.lt.s32.totalorder %s77_s17, %s77_s17 }
  0x31   :  { %p1396_p6 = scmp.ne.s32.totalorder %s77_s17, %s1395_s0  ;;  %p1401_p8 = scmp.lt.s32.totalorder %s1395_s0, %s1395_s0 }
  0x33   :  { %p1402_p9 = por %p1401_p8, %p1400_p7 }
  0x35   :  { %p1403_p10 = pnand %p1402_p9, %p1396_p6 }
  0x37   :  { %1406 = shalt.err (!%p1403_p10)
}
  0x38   :  { %82 = dma.hbm_to_vmem [thread:$0]  %s1641_s6, 12288, %s77_s17, [#allocation9], %s1482_s27, %s1482_s27, %s1483_s28  }
  0x39   :  { %s1486_s22 = smov [#allocation11]  }
  0x3a   :  { %s90_s23 = sshll.u32 %s1486_s22, 4  ;;  %s91_s23 = int_to_ptr.vmem [resolvable:$true] %s90_s23 }
  0x3b   :  { %s1415_s24 = scalar_lea.vmem %s91_s23, 2048  ;;  %p1420_p12 = scmp.lt.s32.totalorder %s91_s23, %s91_s23 }
  0x3c   :  { %p1416_p11 = scmp.ne.s32.totalorder %s91_s23, %s1415_s24  ;;  %p1421_p13 = scmp.lt.s32.totalorder %s1415_s24, %s1415_s24 }
  0x3e   :  { %p1422_p0 = por %p1421_p13, %p1420_p12 }
  0x40   :  { %p1423_p1 = pnand %p1422_p0, %p1416_p11 }
  0x42   :  { %1426 = shalt.err (!%p1423_p1)
}
  0x43   :  { %96 = dma.hbm_to_vmem [thread:$0]  %s1643_s8, 2048, %s91_s23, [#allocation12], %s1482_s27, %s1482_s27, %s1483_s28  }
  0x44   :  { %1467 = dma.done.wait [#allocation3], 768  }
  0x45   :  { %1468 = vsyncadd [#allocation3], 4294966528 }
  0x46   :  { %1469 = dma.done.wait [#allocation6], 13056  }
  0x47   :  { %1470 = vsyncadd [#allocation6], 4294954240 }
  0x48   :  { %1471 = dma.done.wait [#allocation9], 14336  }
  0x49   :  { %1472 = vsyncadd [#allocation9], 4294952960 }
  0x4a   :  { %1473 = dma.done.wait [#allocation12], 2048  }
  0x4b   :  { %1474 = vsyncadd [#allocation12], 4294965248  ;;  %v154_v0 = vld [vmem:[#allocation7 + $0xf8] sm:$0xff]  ;;  %v153_v2 = vld [vmem:[#allocation7 + $0xf0] sm:$0xff]  ;;  %vm1488_vm0 = vmmov 0  }
  0x4c   :  { %v138_v1 = vld [vmem:[#allocation7 + $0x78] sm:$0xff]  ;;  %981 = vmatprep.subr.mxu0 %v154_v0  ;;  %v137_v4 = vld [vmem:[#allocation7 + $0x70] sm:$0xff]  ;;  %v152_v6 = vld [vmem:[#allocation7 + $0xe8] sm:$0xff] }
  0x4d   :  { %v186_v3 = vld [vmem:[#allocation7 + $0x1f8] sm:$0xff]  ;;  %982 = vmatpush3.msra.mxu0 %v138_v1  ;;  %v185_v7 = vld [vmem:[#allocation7 + $0x1f0] sm:$0xff]  ;;  %v136_v8 = vld [vmem:[#allocation7 + $0x68] sm:$0xff] }
  0x4e   :  { %v170_v5 = vld [vmem:[#allocation7 + $0x178] sm:$0xff]  ;;  %1016 = vmatprep.subr.mxu1 %v186_v3  ;;  %983 = vmatprep.subr.mxu0 %v153_v2  ;;  %v169_v9 = vld [vmem:[#allocation7 + $0x170] sm:$0xff]  ;;  %v184_v10 = vld [vmem:[#allocation7 + $0x1e8] sm:$0xff] }
  0x4f   :  { %1017 = vmatpush3.msra.mxu1 %v170_v5  ;;  %984 = vmatpush3.msra.mxu0 %v137_v4  ;;  %v151_v11 = vld [vmem:[#allocation7 + $0xe0] sm:$0xff]  ;;  %v168_v12 = vld [vmem:[#allocation7 + $0x168] sm:$0xff]  ;;  %v150_v15 = vld [vmem:[#allocation7 + $0xd8] sm:$0xff] }
  0x50   :  { %1018 = vmatprep.subr.mxu1 %v185_v7  ;;  %985 = vmatprep.subr.mxu0 %v152_v6  ;;  %v135_v13 = vld [vmem:[#allocation7 + $0x60] sm:$0xff]  ;;  %v134_v17 = vld [vmem:[#allocation7 + $0x58] sm:$0xff]  ;;  %v149_v19 = vld [vmem:[#allocation7 + $0xd0] sm:$0xff] }
  0x51   :  { %1019 = vmatpush3.msra.mxu1 %v169_v9  ;;  %v183_v14 = vld [vmem:[#allocation7 + $0x1e0] sm:$0xff]  ;;  %986 = vmatpush3.msra.mxu0 %v136_v8  ;;  %v182_v18 = vld [vmem:[#allocation7 + $0x1d8] sm:$0xff]  ;;  %v133_v21 = vld [vmem:[#allocation7 + $0x50] sm:$0xff] }
  0x52   :  { %1020 = vmatprep.subr.mxu1 %v184_v10  ;;  %v167_v16 = vld [vmem:[#allocation7 + $0x160] sm:$0xff]  ;;  %987 = vmatprep.subr.mxu0 %v151_v11  ;;  %v166_v20 = vld [vmem:[#allocation7 + $0x158] sm:$0xff]  ;;  %v181_v22 = vld [vmem:[#allocation7 + $0x1d0] sm:$0xff] }
  0x53   :  { %1021 = vmatpush3.msra.mxu1 %v168_v12  ;;  %988 = vmatpush3.msra.mxu0 %v135_v13  ;;  %v148_v23 = vld [vmem:[#allocation7 + $0xc8] sm:$0xff]  ;;  %v165_v24 = vld [vmem:[#allocation7 + $0x150] sm:$0xff]  ;;  %v147_v27 = vld [vmem:[#allocation7 + $0xc0] sm:$0xff] }
  0x54   :  { %1022 = vmatprep.subr.mxu1 %v183_v14  ;;  %989 = vmatprep.subr.mxu0 %v150_v15  ;;  %v132_v25 = vld [vmem:[#allocation7 + $0x48] sm:$0xff]  ;;  %v131_v29 = vld [vmem:[#allocation7 + $0x40] sm:$0xff]  ;;  %v146_v31 = vld [vmem:[#allocation7 + $0xb8] sm:$0xff] }
  0x55   :  { %1023 = vmatpush3.msra.mxu1 %v167_v16  ;;  %990 = vmatpush3.msra.mxu0 %v134_v17  ;;  %v180_v26 = vld [vmem:[#allocation7 + $0x1c8] sm:$0xff]  ;;  %v179_v30 = vld [vmem:[#allocation7 + $0x1c0] sm:$0xff]  ;;  %v130_v33 = vld [vmem:[#allocation7 + $0x38] sm:$0xff] }
  0x56   :  { %1024 = vmatprep.subr.mxu1 %v182_v18  ;;  %991 = vmatprep.subr.mxu0 %v149_v19  ;;  %v164_v28 = vld [vmem:[#allocation7 + $0x148] sm:$0xff]  ;;  %v163_v32 = vld [vmem:[#allocation7 + $0x140] sm:$0xff]  ;;  %v178_v34 = vld [vmem:[#allocation7 + $0x1b8] sm:$0xff] }
  0x57   :  { %1025 = vmatpush3.msra.mxu1 %v166_v20  ;;  %992 = vmatpush3.msra.mxu0 %v133_v21  ;;  %v145_v35 = vld [vmem:[#allocation7 + $0xb0] sm:$0xff]  ;;  %v162_v36 = vld [vmem:[#allocation7 + $0x138] sm:$0xff]  ;;  %v144_v39 = vld [vmem:[#allocation7 + $0xa8] sm:$0xff] }
  0x58   :  { %1026 = vmatprep.subr.mxu1 %v181_v22  ;;  %993 = vmatprep.subr.mxu0 %v148_v23  ;;  %v129_v37 = vld [vmem:[#allocation7 + $0x30] sm:$0xff]  ;;  %v128_v41 = vld [vmem:[#allocation7 + $0x28] sm:$0xff]  ;;  %v143_v43 = vld [vmem:[#allocation7 + $0xa0] sm:$0xff] }
  0x59   :  { %1027 = vmatpush3.msra.mxu1 %v165_v24  ;;  %994 = vmatpush3.msra.mxu0 %v132_v25  ;;  %v177_v38 = vld [vmem:[#allocation7 + $0x1b0] sm:$0xff]  ;;  %v176_v42 = vld [vmem:[#allocation7 + $0x1a8] sm:$0xff]  ;;  %v127_v45 = vld [vmem:[#allocation7 + $0x20] sm:$0xff] }
  0x5a   :  { %1028 = vmatprep.subr.mxu1 %v180_v26  ;;  %995 = vmatprep.subr.mxu0 %v147_v27  ;;  %v161_v40 = vld [vmem:[#allocation7 + $0x130] sm:$0xff]  ;;  %v160_v44 = vld [vmem:[#allocation7 + $0x128] sm:$0xff]  ;;  %v175_v46 = vld [vmem:[#allocation7 + $0x1a0] sm:$0xff] }
  0x5b   :  { %1029 = vmatpush3.msra.mxu1 %v164_v28  ;;  %996 = vmatpush3.msra.mxu0 %v131_v29  ;;  %v142_v47 = vld [vmem:[#allocation7 + $0x98] sm:$0xff]  ;;  %v159_v48 = vld [vmem:[#allocation7 + $0x120] sm:$0xff]  ;;  %v141_v51 = vld [vmem:[#allocation7 + $0x90] sm:$0xff] }
  0x5c   :  { %1030 = vmatprep.subr.mxu1 %v179_v30  ;;  %997 = vmatprep.subr.mxu0 %v146_v31  ;;  %v126_v49 = vld [vmem:[#allocation7 + $0x18] sm:$0xff]  ;;  %v125_v53 = vld [vmem:[#allocation7 + $0x10] sm:$0xff]  ;;  %v140_v55 = vld [vmem:[#allocation7 + $0x88] sm:$0xff] }
  0x5d   :  { %1031 = vmatpush3.msra.mxu1 %v163_v32  ;;  %998 = vmatpush3.msra.mxu0 %v130_v33  ;;  %v174_v50 = vld [vmem:[#allocation7 + $0x198] sm:$0xff]  ;;  %v173_v54 = vld [vmem:[#allocation7 + $0x190] sm:$0xff]  ;;  %v124_v57 = vld [vmem:[#allocation7 + $0x8] sm:$0xff] }
  0x5e   :  { %1032 = vmatprep.subr.mxu1 %v178_v34  ;;  %999 = vmatprep.subr.mxu0 %v145_v35  ;;  %v158_v52 = vld [vmem:[#allocation7 + $0x118] sm:$0xff]  ;;  %v157_v56 = vld [vmem:[#allocation7 + $0x110] sm:$0xff]  ;;  %v172_v58 = vld [vmem:[#allocation7 + $0x188] sm:$0xff] }
  0x5f   :  { %1033 = vmatpush3.msra.mxu1 %v162_v36  ;;  %1000 = vmatpush3.msra.mxu0 %v129_v37  ;;  %v139_v59 = vld [vmem:[#allocation7 + $0x80] sm:$0xff]  ;;  %v118_v60 = vld [vmem:[#allocation2 + $0x8] sm:$0xff]  ;;  %v218_v1 = vld [vmem:[#allocation7 + $0x2f8] sm:$0xff] }
  0x60   :  { %1034 = vmatprep.subr.mxu1 %v177_v38  ;;  %1001 = vmatprep.subr.mxu0 %v144_v39  ;;  %v123_v61 = vld [vmem:[#allocation7] sm:$0xff]  ;;  %v156_v62 = vld [vmem:[#allocation7 + $0x108] sm:$0xff]  ;;  %v120_v3 = vld [vmem:[#allocation2 + $0x18] sm:$0xff] }
  0x61   :  { %1035 = vmatpush3.msra.mxu1 %v161_v40  ;;  %1002 = vmatpush3.msra.mxu0 %v128_v41  ;;  %v117_v63 = vld [vmem:[#allocation2] sm:$0xff]  ;;  %v202_v4 = vld [vmem:[#allocation7 + $0x278] sm:$0xff]  ;;  %v119_v5 = vld [vmem:[#allocation2 + $0x10] sm:$0xff]  ;;  %v1487_v41 = vmov 0.0  }
  0x62   :  { %1036 = vmatprep.subr.mxu1 %v176_v42  ;;  %1003 = vmatprep.subr.mxu0 %v143_v43  ;;  %v171_v0 = vld [vmem:[#allocation7 + $0x180] sm:$0xff]  ;;  %v217_v6 = vld [vmem:[#allocation7 + $0x2f0] sm:$0xff]  ;;  %v122_v8 = vld [vmem:[#allocation2 + $0x28] sm:$0xff] }
  0x63   :  { %1037 = vmatpush3.msra.mxu1 %v160_v44  ;;  %1004 = vmatpush3.msra.mxu0 %v127_v45  ;;  %v155_v2 = vld [vmem:[#allocation7 + $0x100] sm:$0xff]  ;;  %v201_v7 = vld [vmem:[#allocation7 + $0x270] sm:$0xff]  ;;  %v216_v9 = vld [vmem:[#allocation7 + $0x2e8] sm:$0xff] }
  0x64   :  { %1038 = vmatprep.subr.mxu1 %v175_v46  ;;  %1005 = vmatprep.subr.mxu0 %v142_v47  ;;  %v200_v10 = vld [vmem:[#allocation7 + $0x268] sm:$0xff]  ;;  %v215_v11 = vld [vmem:[#allocation7 + $0x2e0] sm:$0xff]  ;;  %v214_v13 = vld [vmem:[#allocation7 + $0x2d8] sm:$0xff] }
  0x65   :  { %1039 = vmatpush3.msra.mxu1 %v159_v48  ;;  %1006 = vmatpush3.msra.mxu0 %v126_v49  ;;  %v199_v12 = vld [vmem:[#allocation7 + $0x260] sm:$0xff]  ;;  %v198_v14 = vld [vmem:[#allocation7 + $0x258] sm:$0xff]  ;;  %v213_v15 = vld [vmem:[#allocation7 + $0x2d0] sm:$0xff] }
  0x66   :  { %1040 = vmatprep.subr.mxu1 %v174_v50  ;;  %1007 = vmatprep.subr.mxu0 %v141_v51  ;;  %v197_v16 = vld [vmem:[#allocation7 + $0x250] sm:$0xff]  ;;  %v212_v17 = vld [vmem:[#allocation7 + $0x2c8] sm:$0xff]  ;;  %v211_v19 = vld [vmem:[#allocation7 + $0x2c0] sm:$0xff] }
  0x67   :  { %1041 = vmatpush3.msra.mxu1 %v158_v52  ;;  %1008 = vmatpush3.msra.mxu0 %v125_v53  ;;  %v196_v18 = vld [vmem:[#allocation7 + $0x248] sm:$0xff]  ;;  %v195_v20 = vld [vmem:[#allocation7 + $0x240] sm:$0xff]  ;;  %v210_v21 = vld [vmem:[#allocation7 + $0x2b8] sm:$0xff] }
  0x68   :  { %1042 = vmatprep.subr.mxu1 %v173_v54  ;;  %1009 = vmatprep.subr.mxu0 %v140_v55  ;;  %v194_v22 = vld [vmem:[#allocation7 + $0x238] sm:$0xff]  ;;  %v209_v23 = vld [vmem:[#allocation7 + $0x2b0] sm:$0xff]  ;;  %v208_v25 = vld [vmem:[#allocation7 + $0x2a8] sm:$0xff] }
  0x69   :  { %1043 = vmatpush3.msra.mxu1 %v157_v56  ;;  %1010 = vmatpush3.msra.mxu0 %v124_v57  ;;  %v193_v24 = vld [vmem:[#allocation7 + $0x230] sm:$0xff]  ;;  %v192_v26 = vld [vmem:[#allocation7 + $0x228] sm:$0xff]  ;;  %v207_v27 = vld [vmem:[#allocation7 + $0x2a0] sm:$0xff] }
  0x6a   :  { %1044 = vmatprep.subr.mxu1 %v172_v58  ;;  %1011 = vmatprep.subr.mxu0 %v139_v59  ;;  %v191_v28 = vld [vmem:[#allocation7 + $0x220] sm:$0xff]  ;;  %v206_v29 = vld [vmem:[#allocation7 + $0x298] sm:$0xff]  ;;  %v205_v31 = vld [vmem:[#allocation7 + $0x290] sm:$0xff] }
  0x6b   :  { %306 = vmatprep.mubr.f32.mxu0 %v118_v60  ;;  %1012 = vmatpush3.msra.mxu0 %v123_v61  ;;  %v190_v30 = vld [vmem:[#allocation7 + $0x218] sm:$0xff]  ;;  %v189_v32 = vld [vmem:[#allocation7 + $0x210] sm:$0xff]  ;;  %v204_v33 = vld [vmem:[#allocation7 + $0x288] sm:$0xff] }
  0x6c   :  { %1045 = vmatpush3.msra.mxu1 %v156_v62  ;;  %307 = vmatmul.mubr.f32.vlgmr.msra.gmra.mxu0 %v117_v63  ;;  %v188_v34 = vld [vmem:[#allocation7 + $0x208] sm:$0xff]  ;;  %v203_v35 = vld [vmem:[#allocation7 + $0x280] sm:$0xff]  ;;  %v568_v38 = vld [vmem:[#allocation10 + $0xf8] sm:$0xff] }
  0x6d   :  { %1046 = vmatprep.subr.mxu1 %v171_v0  ;;  %1051 = vmatprep.subr.mxu0 %v218_v1  ;;  %v187_v36 = vld [vmem:[#allocation7 + $0x200] sm:$0xff]  ;;  %v234_v39 = vld [vmem:[#allocation8 + $0x78] sm:$0xff]  ;;  %v567_v42 = vld [vmem:[#allocation10 + $0xf0] sm:$0xff] }
  0x6e   :  { %1047 = vmatpush3.msra.mxu1 %v155_v2  ;;  %376 = vmatprep.mubr.f32.mxu1 %v120_v3  ;;  %v121_v37 = vld [vmem:[#allocation2 + $0x20] sm:$0xff]  ;;  %v552_v40 = vld [vmem:[#allocation10 + $0x78] sm:$0xff]  ;;  %v233_v43 = vld [vmem:[#allocation8 + $0x70] sm:$0xff] }
  0x6f   :  { %1052 = vmatpush3.msra.mxu0 %v202_v4  ;;  %377 = vmatmul.mubr.f32.vlgmr.msra.gmra.mxu1 %v119_v5  ;;  %v551_v44 = vld [vmem:[#allocation10 + $0x70] sm:$0xff]  ;;  %v566_v45 = vld [vmem:[#allocation10 + $0xe8] sm:$0xff]  ;;  %v565_v48 = vld [vmem:[#allocation10 + $0xe0] sm:$0xff] }
  0x70   :  { %1053 = vmatprep.subr.mxu0 %v217_v6  ;;  %446 = vmatprep.mubr.f32.mxu0 %v122_v8  ;;  %v232_v46 = vld [vmem:[#allocation8 + $0x68] sm:$0xff]  ;;  %v231_v49 = vld [vmem:[#allocation8 + $0x60] sm:$0xff]  ;;  %v564_v51 = vld [vmem:[#allocation10 + $0xd8] sm:$0xff] }
  0x71   :  { %1054 = vmatpush3.msra.mxu0 %v201_v7  ;;  %1225 = vmatprep.subr.mxu1 %v1487_v41  ;;  %v550_v47 = vld [vmem:[#allocation10 + $0x68] sm:$0xff]  ;;  %v549_v50 = vld [vmem:[#allocation10 + $0x60] sm:$0xff]  ;;  %v230_v52 = vld [vmem:[#allocation8 + $0x58] sm:$0xff] }
  0x72   :  { %1055 = vmatprep.subr.mxu0 %v216_v9  ;;  %1226 = vmatpush3.msra.mxu1 %v234_v39  ;;  %v548_v53 = vld [vmem:[#allocation10 + $0x58] sm:$0xff]  ;;  %v563_v54 = vld [vmem:[#allocation10 + $0xd0] sm:$0xff]  ;;  %v562_v57 = vld [vmem:[#allocation10 + $0xc8] sm:$0xff] }
  0x73   :  { %1056 = vmatpush3.msra.mxu0 %v200_v10  ;;  %1227 = vmatprep.subr.mxu1 %v1487_v41  ;;  %v229_v55 = vld [vmem:[#allocation8 + $0x50] sm:$0xff]  ;;  %v228_v58 = vld [vmem:[#allocation8 + $0x48] sm:$0xff]  ;;  %v561_v60 = vld [vmem:[#allocation10 + $0xc0] sm:$0xff] }
  0x74   :  { %1057 = vmatprep.subr.mxu0 %v215_v11  ;;  %1228 = vmatpush3.msra.mxu1 %v233_v43  ;;  %v547_v56 = vld [vmem:[#allocation10 + $0x50] sm:$0xff]  ;;  %v546_v59 = vld [vmem:[#allocation10 + $0x48] sm:$0xff]  ;;  %v227_v61 = vld [vmem:[#allocation8 + $0x40] sm:$0xff] }
  0x75   :  { %1058 = vmatpush3.msra.mxu0 %v199_v12  ;;  %1229 = vmatprep.subr.mxu1 %v1487_v41  ;;  %v545_v62 = vld [vmem:[#allocation10 + $0x40] sm:$0xff]  ;;  %v560_v63 = vld [vmem:[#allocation10 + $0xb8] sm:$0xff]  ;;  %v559_v2 = vld [vmem:[#allocation10 + $0xb0] sm:$0xff] }
  0x76   :  { %1059 = vmatprep.subr.mxu0 %v214_v13  ;;  %1230 = vmatpush3.msra.mxu1 %v232_v46  ;;  %v226_v0 = vld [vmem:[#allocation8 + $0x38] sm:$0xff]  ;;  %v225_v3 = vld [vmem:[#allocation8 + $0x30] sm:$0xff]  ;;  %v558_v5 = vld [vmem:[#allocation10 + $0xa8] sm:$0xff] }
  0x77   :  { %1060 = vmatpush3.msra.mxu0 %v198_v14  ;;  %1231 = vmatprep.subr.mxu1 %v1487_v41  ;;  %v544_v1 = vld [vmem:[#allocation10 + $0x38] sm:$0xff]  ;;  %v543_v4 = vld [vmem:[#allocation10 + $0x30] sm:$0xff]  ;;  %v224_v6 = vld [vmem:[#allocation8 + $0x28] sm:$0xff] }
  0x78   :  { %1061 = vmatprep.subr.mxu0 %v213_v15  ;;  %1232 = vmatpush3.msra.mxu1 %v231_v49  ;;  %v542_v7 = vld [vmem:[#allocation10 + $0x28] sm:$0xff]  ;;  %v557_v8 = vld [vmem:[#allocation10 + $0xa0] sm:$0xff]  ;;  %v556_v11 = vld [vmem:[#allocation10 + $0x98] sm:$0xff] }
  0x79   :  { %1062 = vmatpush3.msra.mxu0 %v197_v16  ;;  %1233 = vmatprep.subr.mxu1 %v1487_v41  ;;  %v223_v9 = vld [vmem:[#allocation8 + $0x20] sm:$0xff]  ;;  %v222_v12 = vld [vmem:[#allocation8 + $0x18] sm:$0xff]  ;;  %v555_v14 = vld [vmem:[#allocation10 + $0x90] sm:$0xff] }
  0x7a   :  { %1063 = vmatprep.subr.mxu0 %v212_v17  ;;  %1234 = vmatpush3.msra.mxu1 %v230_v52  ;;  %v541_v10 = vld [vmem:[#allocation10 + $0x20] sm:$0xff]  ;;  %v540_v13 = vld [vmem:[#allocation10 + $0x18] sm:$0xff]  ;;  %v221_v15 = vld [vmem:[#allocation8 + $0x10] sm:$0xff] }
  0x7b   :  { %1064 = vmatpush3.msra.mxu0 %v196_v18  ;;  %1235 = vmatprep.subr.mxu1 %v1487_v41  ;;  %v539_v16 = vld [vmem:[#allocation10 + $0x10] sm:$0xff]  ;;  %v554_v17 = vld [vmem:[#allocation10 + $0x88] sm:$0xff]  ;;  %v624_v43 = vld [vmem:[#allocation10 + $0x2b8] sm:$0xff] }
  0x7c   :  { %1065 = vmatprep.subr.mxu0 %v211_v19  ;;  %1236 = vmatpush3.msra.mxu1 %v229_v55  ;;  %v220_v18 = vld [vmem:[#allocation8 + $0x8] sm:$0xff]  ;;  %v607_v46 = vld [vmem:[#allocation10 + $0x230] sm:$0xff]  ;;  %v621_v49 = vld [vmem:[#allocation10 + $0x2a0] sm:$0xff] }
  0x7d   :  { %1066 = vmatpush3.msra.mxu0 %v195_v20  ;;  %1237 = vmatprep.subr.mxu1 %v1487_v41  ;;  %v538_v19 = vld [vmem:[#allocation10 + $0x8] sm:$0xff]  ;;  %v553_v20 = vld [vmem:[#allocation10 + $0x80] sm:$0xff]  ;;  %v604_v52 = vld [vmem:[#allocation10 + $0x218] sm:$0xff] }
  0x7e   :  { %1067 = vmatprep.subr.mxu0 %v210_v21  ;;  %1238 = vmatpush3.msra.mxu1 %v228_v58  ;;  %v219_v21 = vld [vmem:[#allocation8] sm:$0xff]  ;;  %v610_v39 = vld [vmem:[#allocation10 + $0x248] sm:$0xff] }
  0x7f   :  { %1068 = vmatpush3.msra.mxu0 %v194_v22  ;;  %1239 = vmatprep.subr.mxu1 %v1487_v41  ;;  %v537_v22 = vld [vmem:[#allocation10] sm:$0xff]  ;;  %v618_v55 = vld [vmem:[#allocation10 + $0x288] sm:$0xff] }
  0x80   :  { %1069 = vmatprep.subr.mxu0 %v209_v23  ;;  %1240 = vmatpush3.msra.mxu1 %v227_v61  ;;  %v532_v23 = vld [vmem:[#allocation5 + $0x8] sm:$0xff]  ;;  %v601_v58 = vld [vmem:[#allocation10 + $0x200] sm:$0xff] }
  0x81   :  { %1070 = vmatpush3.msra.mxu0 %v193_v24  ;;  %1241 = vmatprep.subr.mxu1 %v1487_v41  ;;  %v600_v24 = vld [vmem:[#allocation10 + $0x1f8] sm:$0xff] }
  0x82   :  { %1071 = vmatprep.subr.mxu0 %v208_v25  ;;  %1242 = vmatpush3.msra.mxu1 %v226_v0  ;;  %v632_v25 = vld [vmem:[#allocation10 + $0x2f8] sm:$0xff] }
  0x83   :  { %1072 = vmatpush3.msra.mxu0 %v192_v26  ;;  %1243 = vmatprep.subr.mxu1 %v1487_v41  ;;  %v531_v26 = vld [vmem:[#allocation5] sm:$0xff] }
  0x84   :  { %1073 = vmatprep.subr.mxu0 %v207_v27  ;;  %1244 = vmatpush3.msra.mxu1 %v225_v3  ;;  %v616_v27 = vld [vmem:[#allocation10 + $0x278] sm:$0xff] }
  0x85   :  { %1074 = vmatpush3.msra.mxu0 %v191_v28  ;;  %1245 = vmatprep.subr.mxu1 %v1487_v41  ;;  %v631_v28 = vld [vmem:[#allocation10 + $0x2f0] sm:$0xff] }
  0x86   :  { %1075 = vmatprep.subr.mxu0 %v206_v29  ;;  %1246 = vmatpush3.msra.mxu1 %v224_v6  ;;  %v615_v29 = vld [vmem:[#allocation10 + $0x270] sm:$0xff] }
  0x87   :  { %1076 = vmatpush3.msra.mxu0 %v190_v30  ;;  %1247 = vmatprep.subr.mxu1 %v1487_v41  ;;  %v630_v30 = vld [vmem:[#allocation10 + $0x2e8] sm:$0xff] }
  0x88   :  { %1077 = vmatprep.subr.mxu0 %v205_v31  ;;  %1248 = vmatpush3.msra.mxu1 %v223_v9  ;;  %v614_v31 = vld [vmem:[#allocation10 + $0x268] sm:$0xff] }
  0x89   :  { %1078 = vmatpush3.msra.mxu0 %v189_v32  ;;  %1249 = vmatprep.subr.mxu1 %v1487_v41  ;;  %v629_v32 = vld [vmem:[#allocation10 + $0x2e0] sm:$0xff] }
  0x8a   :  { %1079 = vmatprep.subr.mxu0 %v204_v33  ;;  %1250 = vmatpush3.msra.mxu1 %v222_v12  ;;  %v613_v33 = vld [vmem:[#allocation10 + $0x260] sm:$0xff]  ;;  %v534_v12 = vld [vmem:[#allocation5 + $0x18] sm:$0xff] }
  0x8b   :  { %1080 = vmatpush3.msra.mxu0 %v188_v34  ;;  %1251 = vmatprep.subr.mxu1 %v1487_v41  ;;  %v628_v34 = vld [vmem:[#allocation10 + $0x2d8] sm:$0xff] }
  0x8c   :  { %1081 = vmatprep.subr.mxu0 %v203_v35  ;;  %1252 = vmatpush3.msra.mxu1 %v221_v15  ;;  %v612_v35 = vld [vmem:[#allocation10 + $0x258] sm:$0xff]  ;;  %v598_v15 = vld [vmem:[#allocation10 + $0x1e8] sm:$0xff] }
  0x8d   :  { %1082 = vmatpush3.msra.mxu0 %v187_v36  ;;  %1253 = vmatprep.subr.mxu1 %v1487_v41  ;;  %v627_v36 = vld [vmem:[#allocation10 + $0x2d0] sm:$0xff] }
  0x8e   :  { %447 = vmatmul.mubr.f32.vlgmr.msra.gmra.mxu0 %v121_v37  ;;  %1103 = vmatprep.subr.mxu0 %v568_v38  ;;  %v611_v37 = vld [vmem:[#allocation10 + $0x250] sm:$0xff]  ;;  %v626_v38 = vld [vmem:[#allocation10 + $0x2c8] sm:$0xff] }
  0x8f   :  { %1104 = vmatpush3.msra.mxu0 %v552_v40  ;;  %1254 = vmatpush3.msra.mxu1 %v220_v18  ;;  %v625_v40 = vld [vmem:[#allocation10 + $0x2c0] sm:$0xff] }
  0x90   :  { %1105 = vmatprep.subr.mxu0 %v567_v42  ;;  %1255 = vmatprep.subr.mxu1 %v1487_v41  ;;  %v609_v42 = vld [vmem:[#allocation10 + $0x240] sm:$0xff] }
  0x91   :  { %1106 = vmatpush3.msra.mxu0 %v551_v44  ;;  %1256 = vmatpush3.msra.mxu1 %v219_v21  ;;  %v608_v44 = vld [vmem:[#allocation10 + $0x238] sm:$0xff]  ;;  %v581_v18 = vld [vmem:[#allocation10 + $0x160] sm:$0xff]  ;;  %v595_v21 = vld [vmem:[#allocation10 + $0x1d0] sm:$0xff] }
  0x92   :  { %1107 = vmatprep.subr.mxu0 %v566_v45  ;;  %1257 = vmatprep.mubr.msk.f32.mxu1 %vm1488_vm0, %v1487_v41  ;;  %v623_v45 = vld [vmem:[#allocation10 + $0x2b0] sm:$0xff] }
  0x93   :  { %1108 = vmatpush3.msra.mxu0 %v550_v47  ;;  %720 = vmatprep.mubr.f32.mxu0 %v532_v23  ;;  %v622_v47 = vld [vmem:[#allocation10 + $0x2a8] sm:$0xff] }
  0x94   :  { %1109 = vmatprep.subr.mxu0 %v565_v48  ;;  %1138 = vmatprep.subr.mxu1 %v600_v24  ;;  %v606_v48 = vld [vmem:[#allocation10 + $0x228] sm:$0xff] }
  0x95   :  { %1110 = vmatpush3.msra.mxu0 %v549_v50  ;;  %v605_v50 = vld [vmem:[#allocation10 + $0x220] sm:$0xff]  ;;  %v594_v23 = vld [vmem:[#allocation10 + $0x1c8] sm:$0xff] }
  0x96   :  { %1111 = vmatprep.subr.mxu0 %v564_v51  ;;  %v620_v51 = vld [vmem:[#allocation10 + $0x298] sm:$0xff]  ;;  %v578_v24 = vld [vmem:[#allocation10 + $0x148] sm:$0xff] }
  0x97   :  { %1112 = vmatpush3.msra.mxu0 %v548_v53  ;;  %v619_v53 = vld [vmem:[#allocation10 + $0x290] sm:$0xff] }
  0x98   :  { %1113 = vmatprep.subr.mxu0 %v563_v54  ;;  %v603_v54 = vld [vmem:[#allocation10 + $0x210] sm:$0xff] }
  0x99   :  { %1114 = vmatpush3.msra.mxu0 %v547_v56  ;;  %v602_v56 = vld [vmem:[#allocation10 + $0x208] sm:$0xff] }
  0x9a   :  { %1115 = vmatprep.subr.mxu0 %v562_v57  ;;  %v617_v57 = vld [vmem:[#allocation10 + $0x280] sm:$0xff] }
  0x9b   :  { %1116 = vmatpush3.msra.mxu0 %v546_v59  ;;  %v536_v59 = vld [vmem:[#allocation5 + $0x28] sm:$0xff] }
  0x9c   :  { %1117 = vmatprep.subr.mxu0 %v561_v60  ;;  %v535_v60 = vld [vmem:[#allocation5 + $0x20] sm:$0xff] }
  0x9d   :  { %1118 = vmatpush3.msra.mxu0 %v545_v62 }
  0x9e   :  { %1119 = vmatprep.subr.mxu0 %v560_v63 }
  0x9f   :  { %1120 = vmatpush3.msra.mxu0 %v544_v1  ;;  %v977_v1 = vld [vmem:[%s1638_s3] ss:$0 sm:$0xff] }
  0xa0   :  { %1121 = vmatprep.subr.mxu0 %v559_v2 }
  0xa1   :  { %1122 = vmatpush3.msra.mxu0 %v543_v4 }
  0xa2   :  { %1123 = vmatprep.subr.mxu0 %v558_v5 }
  0xa3   :  { %1124 = vmatpush3.msra.mxu0 %v542_v7 }
  0xa4   :  { %1125 = vmatprep.subr.mxu0 %v557_v8 }
  0xa5   :  { %1126 = vmatpush3.msra.mxu0 %v541_v10 }
  0xa6   :  { %1127 = vmatprep.subr.mxu0 %v556_v11  ;;  %v584_v11 = vld [vmem:[#allocation10 + $0x178] sm:$0xff] }
  0xa7   :  { %1128 = vmatpush3.msra.mxu0 %v540_v13  ;;  %v599_v13 = vld [vmem:[#allocation10 + $0x1f0] sm:$0xff] }
  0xa8   :  { %1129 = vmatprep.subr.mxu0 %v555_v14  ;;  %v583_v14 = vld [vmem:[#allocation10 + $0x170] sm:$0xff] }
  0xa9   :  { %1130 = vmatpush3.msra.mxu0 %v539_v16  ;;  %v582_v16 = vld [vmem:[#allocation10 + $0x168] sm:$0xff] }
  0xaa   :  { %1131 = vmatprep.subr.mxu0 %v554_v17  ;;  %v597_v17 = vld [vmem:[#allocation10 + $0x1e0] sm:$0xff] }
  0xab   :  { %1132 = vmatpush3.msra.mxu0 %v538_v19  ;;  %v596_v19 = vld [vmem:[#allocation10 + $0x1d8] sm:$0xff] }
  0xac   :  { %1133 = vmatprep.subr.mxu0 %v553_v20  ;;  %v580_v20 = vld [vmem:[#allocation10 + $0x158] sm:$0xff] }
  0xad   :  { %1134 = vmatpush3.msra.mxu0 %v537_v22  ;;  %v579_v22 = vld [vmem:[#allocation10 + $0x150] sm:$0xff] }
  0xae   :  { %1173 = vmatprep.subr.mxu0 %v632_v25  ;;  %721 = vmatmul.mubr.f32.vlgmr.msra.gmra.mxu0 %v531_v26  ;;  %v593_v25 = vld [vmem:[#allocation10 + $0x1c0] sm:$0xff] }
  0xaf   :  { %1174 = vmatpush3.msra.mxu0 %v616_v27  ;;  %860 = vmatprep.mubr.f32.mxu0 %v536_v59  ;;  %v577_v26 = vld [vmem:[#allocation10 + $0x140] sm:$0xff]  ;;  %v592_v27 = vld [vmem:[#allocation10 + $0x1b8] sm:$0xff]  ;;  %v634_v59 = vld [vmem:[#allocation11 + $0x8] sm:$0xff] }
  0xb0   :  { %1175 = vmatprep.subr.mxu0 %v631_v28  ;;  %v576_v28 = vld [vmem:[#allocation10 + $0x138] sm:$0xff] }
  0xb1   :  { %1176 = vmatpush3.msra.mxu0 %v615_v29  ;;  %v591_v29 = vld [vmem:[#allocation10 + $0x1b0] sm:$0xff] }
  0xb2   :  { %1177 = vmatprep.subr.mxu0 %v630_v30  ;;  %v575_v30 = vld [vmem:[#allocation10 + $0x130] sm:$0xff] }
  0xb3   :  { %1178 = vmatpush3.msra.mxu0 %v614_v31  ;;  %v590_v31 = vld [vmem:[#allocation10 + $0x1a8] sm:$0xff] }
  0xb4   :  { %1179 = vmatprep.subr.mxu0 %v629_v32  ;;  %v574_v32 = vld [vmem:[#allocation10 + $0x128] sm:$0xff] }
  0xb5   :  { %1180 = vmatpush3.msra.mxu0 %v613_v33  ;;  %v589_v33 = vld [vmem:[#allocation10 + $0x1a0] sm:$0xff] }
  0xb6   :  { %1181 = vmatprep.subr.mxu0 %v628_v34  ;;  %v573_v34 = vld [vmem:[#allocation10 + $0x120] sm:$0xff] }
  0xb7   :  { %1182 = vmatpush3.msra.mxu0 %v612_v35  ;;  %v588_v35 = vld [vmem:[#allocation10 + $0x198] sm:$0xff] }
  0xb8   :  { %1183 = vmatprep.subr.mxu0 %v627_v36  ;;  %v572_v36 = vld [vmem:[#allocation10 + $0x118] sm:$0xff] }
  0xb9   :  { %1184 = vmatpush3.msra.mxu0 %v611_v37  ;;  %v587_v37 = vld [vmem:[#allocation10 + $0x190] sm:$0xff] }
  0xba   :  { %1185 = vmatprep.subr.mxu0 %v626_v38  ;;  %v571_v38 = vld [vmem:[#allocation10 + $0x110] sm:$0xff] }
  0xbb   :  { %1186 = vmatpush3.msra.mxu0 %v610_v39  ;;  %v586_v39 = vld [vmem:[#allocation10 + $0x188] sm:$0xff] }
  0xbc   :  { %1187 = vmatprep.subr.mxu0 %v625_v40  ;;  %v570_v40 = vld [vmem:[#allocation10 + $0x108] sm:$0xff] }
  0xbd   :  { %1188 = vmatpush3.msra.mxu0 %v609_v42  ;;  %v585_v42 = vld [vmem:[#allocation10 + $0x180] sm:$0xff] }
  0xbe   :  { %1189 = vmatprep.subr.mxu0 %v624_v43  ;;  %v569_v43 = vld [vmem:[#allocation10 + $0x100] sm:$0xff] }
  0xbf   :  { %1190 = vmatpush3.msra.mxu0 %v608_v44  ;;  %v533_v44 = vld [vmem:[#allocation5 + $0x10] sm:$0xff] }
  0xc0   :  { %1191 = vmatprep.subr.mxu0 %v623_v45  ;;  %v648_v45 = vld [vmem:[#allocation11 + $0x78] sm:$0xff] }
  0xc1   :  { %1192 = vmatpush3.msra.mxu0 %v607_v46  ;;  %v647_v46 = vld [vmem:[#allocation11 + $0x70] sm:$0xff] }
  0xc2   :  { %1193 = vmatprep.subr.mxu0 %v622_v47  ;;  %v646_v47 = vld [vmem:[#allocation11 + $0x68] sm:$0xff] }
  0xc3   :  { %1194 = vmatpush3.msra.mxu0 %v606_v48  ;;  %v645_v48 = vld [vmem:[#allocation11 + $0x60] sm:$0xff] }
  0xc4   :  { %1195 = vmatprep.subr.mxu0 %v621_v49  ;;  %v644_v49 = vld [vmem:[#allocation11 + $0x58] sm:$0xff] }
  0xc5   :  { %1196 = vmatpush3.msra.mxu0 %v605_v50  ;;  %v643_v50 = vld [vmem:[#allocation11 + $0x50] sm:$0xff] }
  0xc6   :  { %1197 = vmatprep.subr.mxu0 %v620_v51  ;;  %v642_v51 = vld [vmem:[#allocation11 + $0x48] sm:$0xff] }
  0xc7   :  { %1198 = vmatpush3.msra.mxu0 %v604_v52  ;;  %v641_v52 = vld [vmem:[#allocation11 + $0x40] sm:$0xff] }
  0xc8   :  { %1199 = vmatprep.subr.mxu0 %v619_v53  ;;  %v640_v53 = vld [vmem:[#allocation11 + $0x38] sm:$0xff] }
  0xc9   :  { %1200 = vmatpush3.msra.mxu0 %v603_v54  ;;  %v639_v54 = vld [vmem:[#allocation11 + $0x30] sm:$0xff] }
  0xca   :  { %1201 = vmatprep.subr.mxu0 %v618_v55  ;;  %v638_v55 = vld [vmem:[#allocation11 + $0x28] sm:$0xff] }
  0xcb   :  { %1202 = vmatpush3.msra.mxu0 %v602_v56  ;;  %v637_v56 = vld [vmem:[#allocation11 + $0x20] sm:$0xff] }
  0xcc   :  { %1203 = vmatprep.subr.mxu0 %v617_v57  ;;  %v636_v57 = vld [vmem:[#allocation11 + $0x18] sm:$0xff] }
  0xcd   :  { %1204 = vmatpush3.msra.mxu0 %v601_v58  ;;  %v635_v58 = vld [vmem:[#allocation11 + $0x10] sm:$0xff] }
  0xce   :  { %861 = vmatmul.mubr.f32.vlgmr.msra.gmra.mxu0 %v535_v60  ;;  %v633_v60 = vld [vmem:[#allocation11] sm:$0xff] }
 0x12c   :  { %v1013_v61 = vpop.f32.mrf.mxu0 }
 0x12e   :  { %v1014_v62 = vpop.f32.mrf.mxu0 }
 0x12f   :  { %v1048_v63 = vpop.f32.mrf.mxu1  ;;  %v1015_v0 = vadd.f32 %v1014_v62, %v1013_v61  ;;  %v978_v61 = vld [vmem:[%s1640_s5] ss:$0 sm:$0xff]  ;;  %s1489_s5 = smov [#allocation13]  }
 0x130   :  { %s951_s29 = sshll.u32 %s1489_s5, 4  ;;  %s952_s29 = int_to_ptr.vmem [resolvable:$true] %s951_s29 }
 0x131   :  { %v1049_v2 = vpop.f32.mrf.mxu1  ;;  %v309_v3 = vadd.f32 %v1015_v0, %v977_v1  ;;  %s1427_s30 = scalar_lea.vmem %s952_s29, 128  ;;  %p1432_p3 = scmp.lt.s32.totalorder %s952_s29, %s952_s29 }
 0x132   :  { %v1050_v4 = vadd.f32 %v1049_v2, %v1048_v63  ;;  %p1428_p2 = scmp.ne.s32.totalorder %s952_s29, %s1427_s30  ;;  %p1433_p4 = scmp.lt.s32.totalorder %s1427_s30, %s1427_s30 }
 0x134   :  { %v379_v7 = vadd.f32 %v1050_v4, %v309_v3  ;;  %p1434_p5 = por %p1433_p4, %p1432_p3 }
 0x136   :  { %p1435_p6 = pnand %p1434_p5, %p1428_p2 }
 0x14e   :  { %v1083_v5 = vpop.f32.mrf.mxu0 }
 0x150   :  { %v1084_v6 = vpop.f32.mrf.mxu0 }
 0x151   :  { %v1085_v8 = vadd.f32 %v1084_v6, %v1083_v5  ;;  %v979_v5 = vld [vmem:[%s1642_s7] ss:$0 sm:$0xff] }
 0x153   :  { %v449_v9 = vadd.f32 %v1085_v8, %v379_v7 }
 0x155   :  { %v452_v10 = vmax.f32 %v449_v9, 0.0 }
 0x157   :  { %1258 = vmatmul.mubr.f32.vlgmr.msra.gmra.mxu1 %v452_v10 }
 0x158   :  { %1139 = vmatpush3.msra.mxu1 %v584_v11  ;;  %790 = vmatprep.mubr.f32.mxu1 %v534_v12 }
 0x159   :  { %1140 = vmatprep.subr.mxu1 %v599_v13 }
 0x15a   :  { %1141 = vmatpush3.msra.mxu1 %v583_v14 }
 0x15b   :  { %1142 = vmatprep.subr.mxu1 %v598_v15 }
 0x15c   :  { %1143 = vmatpush3.msra.mxu1 %v582_v16 }
 0x15d   :  { %1144 = vmatprep.subr.mxu1 %v597_v17 }
 0x15e   :  { %1145 = vmatpush3.msra.mxu1 %v581_v18 }
 0x15f   :  { %1146 = vmatprep.subr.mxu1 %v596_v19 }
 0x160   :  { %1147 = vmatpush3.msra.mxu1 %v580_v20 }
 0x161   :  { %1148 = vmatprep.subr.mxu1 %v595_v21 }
 0x162   :  { %1149 = vmatpush3.msra.mxu1 %v579_v22 }
 0x163   :  { %1150 = vmatprep.subr.mxu1 %v594_v23 }
 0x164   :  { %1151 = vmatpush3.msra.mxu1 %v578_v24 }
 0x165   :  { %1152 = vmatprep.subr.mxu1 %v593_v25 }
 0x166   :  { %1153 = vmatpush3.msra.mxu1 %v577_v26 }
 0x167   :  { %1154 = vmatprep.subr.mxu1 %v592_v27 }
 0x168   :  { %1155 = vmatpush3.msra.mxu1 %v576_v28 }
 0x169   :  { %1156 = vmatprep.subr.mxu1 %v591_v29 }
 0x16a   :  { %1157 = vmatpush3.msra.mxu1 %v575_v30 }
 0x16b   :  { %1158 = vmatprep.subr.mxu1 %v590_v31 }
 0x16c   :  { %1159 = vmatpush3.msra.mxu1 %v574_v32 }
 0x16d   :  { %1160 = vmatprep.subr.mxu1 %v589_v33 }
 0x16e   :  { %1161 = vmatpush3.msra.mxu1 %v573_v34  ;;  %v1135_v1 = vpop.f32.mrf.mxu0 }
 0x16f   :  { %1162 = vmatprep.subr.mxu1 %v588_v35 }
 0x170   :  { %1163 = vmatpush3.msra.mxu1 %v572_v36  ;;  %v1136_v2 = vpop.f32.mrf.mxu0 }
 0x171   :  { %1164 = vmatprep.subr.mxu1 %v587_v37  ;;  %v1137_v4 = vadd.f32 %v1136_v2, %v1135_v1 }
 0x172   :  { %1165 = vmatpush3.msra.mxu1 %v571_v38 }
 0x173   :  { %1166 = vmatprep.subr.mxu1 %v586_v39  ;;  %v723_v8 = vadd.f32 %v1137_v4, %v979_v5 }
 0x174   :  { %1167 = vmatpush3.msra.mxu1 %v570_v40 }
 0x175   :  { %1168 = vmatprep.subr.mxu1 %v585_v42 }
 0x176   :  { %1169 = vmatpush3.msra.mxu1 %v569_v43 }
 0x177   :  { %791 = vmatmul.mubr.f32.vlgmr.msra.gmra.mxu1 %v533_v44  ;;  %1260 = vmatprep.subr.mxu1 %v1487_v41 }
 0x178   :  { %1292 = vmatprep.mubr.msk.f32.mxu1 %vm1488_vm0, %v1487_v41  ;;  %1261 = vmatpush3.msra.mxu1 %v648_v45 }
 0x179   :  { %1262 = vmatprep.subr.mxu1 %v1487_v41 }
 0x17a   :  { %1263 = vmatpush3.msra.mxu1 %v647_v46 }
 0x17b   :  { %1264 = vmatprep.subr.mxu1 %v1487_v41 }
 0x17c   :  { %1265 = vmatpush3.msra.mxu1 %v646_v47 }
 0x17d   :  { %1266 = vmatprep.subr.mxu1 %v1487_v41 }
 0x17e   :  { %1267 = vmatpush3.msra.mxu1 %v645_v48 }
 0x17f   :  { %1268 = vmatprep.subr.mxu1 %v1487_v41 }
 0x180   :  { %1269 = vmatpush3.msra.mxu1 %v644_v49 }
 0x181   :  { %1270 = vmatprep.subr.mxu1 %v1487_v41 }
 0x182   :  { %1271 = vmatpush3.msra.mxu1 %v643_v50 }
 0x183   :  { %1272 = vmatprep.subr.mxu1 %v1487_v41 }
 0x184   :  { %1273 = vmatpush3.msra.mxu1 %v642_v51 }
 0x185   :  { %1274 = vmatprep.subr.mxu1 %v1487_v41 }
 0x186   :  { %1275 = vmatpush3.msra.mxu1 %v641_v52 }
 0x187   :  { %1276 = vmatprep.subr.mxu1 %v1487_v41 }
 0x188   :  { %1277 = vmatpush3.msra.mxu1 %v640_v53 }
 0x189   :  { %1278 = vmatprep.subr.mxu1 %v1487_v41 }
 0x18a   :  { %1279 = vmatpush3.msra.mxu1 %v639_v54 }
 0x18b   :  { %1280 = vmatprep.subr.mxu1 %v1487_v41 }
 0x18c   :  { %1281 = vmatpush3.msra.mxu1 %v638_v55 }
 0x18d   :  { %1282 = vmatprep.subr.mxu1 %v1487_v41 }
 0x18e   :  { %1283 = vmatpush3.msra.mxu1 %v637_v56  ;;  %v1205_v3 = vpop.f32.mrf.mxu0 }
 0x18f   :  { %1284 = vmatprep.subr.mxu1 %v1487_v41 }
 0x190   :  { %1285 = vmatpush3.msra.mxu1 %v636_v57  ;;  %v1206_v7 = vpop.f32.mrf.mxu0 }
 0x191   :  { %1286 = vmatprep.subr.mxu1 %v1487_v41  ;;  %v1207_v11 = vadd.f32 %v1206_v7, %v1205_v3 }
 0x192   :  { %1287 = vmatpush3.msra.mxu1 %v635_v58 }
 0x193   :  { %1288 = vmatprep.subr.mxu1 %v1487_v41 }
 0x194   :  { %1289 = vmatpush3.msra.mxu1 %v634_v59 }
 0x195   :  { %1290 = vmatprep.subr.mxu1 %v1487_v41 }
 0x196   :  { %1291 = vmatpush3.msra.mxu1 %v633_v60 }
 0x217   :  { %v526_v62 = vpop.f32.mrf.mxu1 }
 0x218   :  { %v527_v63 = vadd.f32 %v978_v61, %v526_v62 }
 0x219   :  { %v1259_v0 = vpop.f32.mrf.mxu1 }
 0x21a   :  { %530 = vst [vmem:[#allocation13] sm:$0xff] %v527_v63 }
 0x237   :  { %v1170_v6 = vpop.f32.mrf.mxu1 }
 0x239   :  { %v1171_v41 = vpop.f32.mrf.mxu1 }
 0x23a   :  { %v1172_v9 = vadd.f32 %v1171_v41, %v1170_v6 }
 0x23c   :  { %v793_v10 = vadd.f32 %v1172_v9, %v723_v8 }
 0x23e   :  { %v863_v12 = vadd.f32 %v1207_v11, %v793_v10 }
 0x240   :  { %v866_v13 = vmax.f32 %v863_v12, 0.0 }
 0x242   :  { %1293 = vmatmul.mubr.f32.vlgmr.msra.gmra.mxu1 %v866_v13 }
 0x243   :  { %1438 = shalt.err (!%p1435_p6)
}
 0x244   :  { %954 = dma.vmem_to_hbm [thread:$0]  %s952_s29, 128, %s1645_s10, [#allocation4]   ;;  %v980_v14 = vld [vmem:[%s1644_s9] ss:$0 sm:$0xff] }
 0x245   :  { %s1490_s14 = smov [#allocation14]  }
 0x246   :  { %s961_s15 = sshll.u32 %s1490_s14, 4  ;;  %s962_s15 = int_to_ptr.vmem [resolvable:$true] %s961_s15 }
 0x247   :  { %s1447_s16 = scalar_lea.vmem %s962_s15, 128  ;;  %p1452_p8 = scmp.lt.s32.totalorder %s962_s15, %s962_s15 }
 0x248   :  { %p1448_p7 = scmp.ne.s32.totalorder %s962_s15, %s1447_s16  ;;  %p1453_p9 = scmp.lt.s32.totalorder %s1447_s16, %s1447_s16 }
 0x24a   :  { %p1454_p10 = por %p1453_p9, %p1452_p8 }
 0x24c   :  { %p1455_p11 = pnand %p1454_p10, %p1448_p7 }
 0x302   :  { %v940_v15 = vpop.f32.mrf.mxu1 }
 0x303   :  { %v941_v16 = vadd.f32 %v980_v14, %v940_v15 }
 0x304   :  { %v1294_v17 = vpop.f32.mrf.mxu1 }
 0x305   :  { %944 = vst [vmem:[#allocation14] sm:$0xff] %v941_v16 }
 0x306   :  { %1458 = shalt.err (!%p1455_p11)
}
 0x307   :  { %964 = dma.vmem_to_hbm [thread:$0]  %s962_s15, 128, %s1646_s11, [#allocation15]  }
 0x308   :  { %1475 = dma.done.wait [#allocation4], 128  }
 0x309   :  { %1476 = vsyncadd [#allocation4], 4294967168 }
 0x30a   :  { %1477 = dma.done.wait [#allocation15], 128  }
 0x30b   :  { %1478 = vsyncadd [#allocation15], 4294967168 }
 0x30c   :  { %971 = vsyncpa [#allocation3], 1 }
 0x30d   :  { %972 = vsyncpa [#allocation6], 1 }
 0x30e   :  { %973 = vsyncpa [#allocation9], 1 }
 0x30f   :  { %974 = vsyncpa [#allocation12], 1 }
 0x310   :  { %975 = vsyncpa [#allocation4], 1 }
 0x311   :  { %976 = vsyncpa [#allocation15], 1 }

</bundles_post_ra>
